<compile_context>
chip_gen: v7x
topology: tpu7x:2x2x1
jax: 0.10.0
libtpu: 0.0.40
codegen_flags: <defaults>
</compile_context>

<pallas_src>
import jax
import jax.numpy as jnp
from jax.experimental import pallas as pl
from jax.experimental.pallas import tpu as pltpu

BN_EPS = 1e-5
PAD_OUT = 128  # lane-dense padded output width


def _bn_relu(h, bn_ref):
    """Fused BatchNorm1d (batch stats) + ReLU. bn_ref rows: [gamma; beta], shape (2, N)."""
    mu = jnp.mean(h, axis=0, keepdims=True)
    msq = jnp.mean(h * h, axis=0, keepdims=True)
    var = jnp.maximum(msq - mu * mu, 0.0)          # guard tiny negative from cancellation
    scale = bn_ref[0:1, :] * jax.lax.rsqrt(var + BN_EPS)
    shift = bn_ref[1:2, :] - mu * scale
    return jnp.maximum(h * scale + shift, 0.0)


def twolayer_kernel(x_ref, w1_ref, bn1_ref, w2_ref, bn2_ref, w3_ref, b3_ref, o_ref):
    # ---- layer 1: Linear (no bias: cancels under BN) + BN + ReLU ----
    h = jnp.dot(x_ref[...], w1_ref[...], preferred_element_type=jnp.float32)
    h = _bn_relu(h, bn1_ref)

    # ---- layer 2: Linear (no bias) + BN + ReLU ----
    h = jnp.dot(h.astype(jnp.bfloat16), w2_ref[...], preferred_element_type=jnp.float32)
    h = _bn_relu(h, bn2_ref)

    # ---- output layer: Linear (padded to 128 lanes) + Softmax(dim=1) ----
    logits = jnp.dot(h.astype(jnp.bfloat16), w3_ref[...],
                     preferred_element_type=jnp.float32) + b3_ref[...]
    m = jnp.max(logits, axis=1, keepdims=True)
    e = jnp.exp(logits - m)                        # padded cols: exp(-huge) == 0
    s = jnp.sum(e, axis=1, keepdims=True)
    inv = pl.reciprocal(s, approx=True)            # EUP slot (off the VPU)
    inv = inv * (2.0 - s * inv)                    # one Newton step -> ~f32 accuracy
    o_ref[...] = e * inv


def two_layer_forward(x, params):
    """x: (B, num_inputs) f32. Returns (B, num_outputs) f32 softmax probabilities."""
    B = x.shape[0]
    num_outputs = params["num_outputs"]
    args = (x.astype(jnp.bfloat16),
            params["w1"], params["bn1"],
            params["w2"], params["bn2"],
            params["w3p"], params["b3p"])
    vmem = pl.BlockSpec(memory_space=pltpu.MemorySpace.VMEM)
    # TODO(synk): at realistic batch sizes, add a feature-axis grid ("parallel") so both
    # v7x TensorCores get work; the batch axis must NOT be tiled (BN uses batch stats).
    out = pl.pallas_call(
        twolayer_kernel,
        out_shape=jax.ShapeDtypeStruct((B, PAD_OUT), jnp.float32),
        in_specs=[vmem] * len(args),
        out_specs=vmem,
        compiler_params=pltpu.CompilerParams(vmem_limit_bytes=32 * 1024 * 1024),
    )(*args)
    return out[:, :num_outputs]


def init_params(key, num_inputs, num_outputs, num_neurons=256):
    """Deterministic synthetic init (PyTorch-style uniform fan-in scaling)."""
    ks = jax.random.split(key, 6)

    def uniform(k, shape, fan_in):
        bound = 1.0 / jnp.sqrt(fan_in)
        return jax.random.uniform(k, shape, jnp.float32, -bound, bound)

    # b1/b2 intentionally omitted: they cancel exactly under the following BatchNorm.
    w1 = uniform(ks[0], (num_inputs, num_neurons), num_inputs)
    w2 = uniform(ks[2], (num_neurons, num_neurons), num_neurons)
    w3 = uniform(ks[4], (num_neurons, num_outputs), num_neurons)
    b3 = uniform(ks[5], (1, num_outputs), num_neurons)

    # BatchNorm1d default init: gamma=1, beta=0; packed as rows of one (2, N) array.
    bn = jnp.concatenate([jnp.ones((1, num_neurons), jnp.float32),
                          jnp.zeros((1, num_neurons), jnp.float32)], axis=0)

    # Lane-dense output padding: zero weight columns, -1e30 bias in padded columns
    # so the padded logits vanish under softmax.
    w3p = jnp.zeros((num_neurons, PAD_OUT), jnp.float32).at[:, :num_outputs].set(w3)
    b3p = jnp.full((1, PAD_OUT), -1e30, jnp.float32).at[:, :num_outputs].set(b3)

    return {"w1": w1.astype(jnp.bfloat16), "bn1": bn,
            "w2": w2.astype(jnp.bfloat16), "bn2": bn,
            "w3p": w3p.astype(jnp.bfloat16), "b3p": b3p,
            "num_outputs": num_outputs}


def reference_forward(x, p):
    """Pure-JAX reference mirroring the kernel's bf16 matmul quantization."""
    def bn_relu(h, bn):
        g, be = bn[0:1, :], bn[1:2, :]
        h = (h - h.mean(0, keepdims=True)) / jnp.sqrt(h.var(0, keepdims=True) + BN_EPS)
        return jnp.maximum(h * g + be, 0.0)

    h = jnp.dot(x.astype(jnp.bfloat16), p["w1"], preferred_element_type=jnp.float32)
    h = bn_relu(h, p["bn1"])
    h = jnp.dot(h.astype(jnp.bfloat16), p["w2"], preferred_element_type=jnp.float32)
    h = bn_relu(h, p["bn2"])
    logits = jnp.dot(h.astype(jnp.bfloat16), p["w3p"],
                     preferred_element_type=jnp.float32) + p["b3p"]
    return jax.nn.softmax(logits, axis=1)[:, :p["num_outputs"]]


if __name__ == "__main__":
    B, NUM_INPUTS, NUM_OUTPUTS, NUM_NEURONS = 8, 32, 16, 256

    key = jax.random.PRNGKey(0)
    kx, kp = jax.random.split(key)
    x = jax.random.normal(kx, (B, NUM_INPUTS), jnp.float32)
    params = init_params(kp, NUM_INPUTS, NUM_OUTPUTS, NUM_NEURONS)

    out = jax.block_until_ready(two_layer_forward(x, params))
    ref = reference_forward(x, params)

    assert out.shape == (B, NUM_OUTPUTS)
    assert jnp.allclose(jnp.sum(out, axis=1), 1.0, atol=1e-3)
    assert jnp.allclose(out, ref, atol=1e-3, rtol=1e-3)

    print("KERNEL_OK")
</pallas_src>

<mosaic_0001>
module attributes {stable_mosaic.version = 11 : i64} {
  func.func @twolayer_kernel(%arg0: memref<8x32xbf16, #tpu.memory_space<vmem>>, %arg1: memref<32x256xbf16, #tpu.memory_space<vmem>>, %arg2: memref<2x256xf32, #tpu.memory_space<vmem>>, %arg3: memref<256x256xbf16, #tpu.memory_space<vmem>>, %arg4: memref<2x256xf32, #tpu.memory_space<vmem>>, %arg5: memref<256x128xbf16, #tpu.memory_space<vmem>>, %arg6: memref<1x128xf32, #tpu.memory_space<vmem>>, %arg7: memref<8x128xf32, #tpu.memory_space<vmem>>) attributes {dimension_semantics = [], scalar_prefetch = 0 : i64, scratch_operands = 0 : i64, tpu.core_type = #tpu.core_type<tc>} {
    %c0 = arith.constant 0 : index
    %c0_0 = arith.constant 0 : index
    %0 = vector.load %arg0[%c0, %c0_0] : memref<8x32xbf16, #tpu.memory_space<vmem>>, vector<8x32xbf16>
    %c0_1 = arith.constant 0 : index
    %c0_2 = arith.constant 0 : index
    %1 = vector.load %arg1[%c0_1, %c0_2] : memref<32x256xbf16, #tpu.memory_space<vmem>>, vector<32x256xbf16>
    %cst = arith.constant dense<0.000000e+00> : vector<8x256xf32>
    %2 = tpu.matmul %0, %1, %cst {dimension_numbers = #tpu.dot_dimension_numbers<[1], [0], [0], [1], [0, 0, 1, 1], [], []>} : vector<8x32xbf16>, vector<32x256xbf16>, vector<8x256xf32> -> vector<8x256xf32>
    %cst_3 = arith.constant dense<0.000000e+00> : vector<256xf32>
    %3 = vector.multi_reduction <add>, %2, %cst_3 [0] : vector<8x256xf32> to vector<256xf32>
    %4 = vector.shape_cast %3 : vector<256xf32> to vector<1x256xf32>
    %cst_4 = arith.constant 8.000000e+00 : f32
    %5 = vector.broadcast %cst_4 : f32 to vector<1x256xf32>
    %6 = arith.divf %4, %5 : vector<1x256xf32>
    %7 = arith.mulf %2, %2 : vector<8x256xf32>
    %cst_5 = arith.constant dense<0.000000e+00> : vector<256xf32>
    %8 = vector.multi_reduction <add>, %7, %cst_5 [0] : vector<8x256xf32> to vector<256xf32>
    %9 = vector.shape_cast %8 : vector<256xf32> to vector<1x256xf32>
    %cst_6 = arith.constant 8.000000e+00 : f32
    %10 = vector.broadcast %cst_6 : f32 to vector<1x256xf32>
    %11 = arith.divf %9, %10 : vector<1x256xf32>
    %12 = arith.mulf %6, %6 : vector<1x256xf32>
    %13 = arith.subf %11, %12 : vector<1x256xf32>
    %cst_7 = arith.constant 0.000000e+00 : f32
    %14 = vector.broadcast %cst_7 : f32 to vector<1x256xf32>
    %15 = arith.maximumf %13, %14 : vector<1x256xf32>
    %c0_8 = arith.constant 0 : index
    %c0_9 = arith.constant 0 : index
    %16 = vector.load %arg2[%c0_8, %c0_9] : memref<2x256xf32, #tpu.memory_space<vmem>>, vector<1x256xf32>
    %cst_10 = arith.constant 9.99999974E-6 : f32
    %17 = vector.broadcast %cst_10 : f32 to vector<1x256xf32>
    %18 = arith.addf %15, %17 : vector<1x256xf32>
    %19 = math.rsqrt %18 : vector<1x256xf32>
    %20 = arith.mulf %16, %19 : vector<1x256xf32>
    %c1 = arith.constant 1 : index
    %c0_11 = arith.constant 0 : index
    %21 = vector.load %arg2[%c1, %c0_11] : memref<2x256xf32, #tpu.memory_space<vmem>>, vector<1x256xf32>
    %22 = arith.mulf %6, %20 : vector<1x256xf32>
    %23 = arith.subf %21, %22 : vector<1x256xf32>
    %24 = vector.broadcast %20 : vector<1x256xf32> to vector<8x256xf32>
    %25 = arith.mulf %2, %24 : vector<8x256xf32>
    %26 = vector.broadcast %23 : vector<1x256xf32> to vector<8x256xf32>
    %27 = arith.addf %25, %26 : vector<8x256xf32>
    %cst_12 = arith.constant 0.000000e+00 : f32
    %28 = vector.broadcast %cst_12 : f32 to vector<8x256xf32>
    %29 = arith.maximumf %27, %28 : vector<8x256xf32>
    %30 = arith.truncf %29 : vector<8x256xf32> to vector<8x256xbf16>
    %c0_13 = arith.constant 0 : index
    %c0_14 = arith.constant 0 : index
    %31 = vector.load %arg3[%c0_13, %c0_14] : memref<256x256xbf16, #tpu.memory_space<vmem>>, vector<256x256xbf16>
    %cst_15 = arith.constant dense<0.000000e+00> : vector<8x256xf32>
    %32 = tpu.matmul %30, %31, %cst_15 {dimension_numbers = #tpu.dot_dimension_numbers<[1], [0], [0], [1], [0, 0, 1, 1], [], []>} : vector<8x256xbf16>, vector<256x256xbf16>, vector<8x256xf32> -> vector<8x256xf32>
    %cst_16 = arith.constant dense<0.000000e+00> : vector<256xf32>
    %33 = vector.multi_reduction <add>, %32, %cst_16 [0] : vector<8x256xf32> to vector<256xf32>
    %34 = vector.shape_cast %33 : vector<256xf32> to vector<1x256xf32>
    %cst_17 = arith.constant 8.000000e+00 : f32
    %35 = vector.broadcast %cst_17 : f32 to vector<1x256xf32>
    %36 = arith.divf %34, %35 : vector<1x256xf32>
    %37 = arith.mulf %32, %32 : vector<8x256xf32>
    %cst_18 = arith.constant dense<0.000000e+00> : vector<256xf32>
    %38 = vector.multi_reduction <add>, %37, %cst_18 [0] : vector<8x256xf32> to vector<256xf32>
    %39 = vector.shape_cast %38 : vector<256xf32> to vector<1x256xf32>
    %cst_19 = arith.constant 8.000000e+00 : f32
    %40 = vector.broadcast %cst_19 : f32 to vector<1x256xf32>
    %41 = arith.divf %39, %40 : vector<1x256xf32>
    %42 = arith.mulf %36, %36 : vector<1x256xf32>
    %43 = arith.subf %41, %42 : vector<1x256xf32>
    %cst_20 = arith.constant 0.000000e+00 : f32
    %44 = vector.broadcast %cst_20 : f32 to vector<1x256xf32>
    %45 = arith.maximumf %43, %44 : vector<1x256xf32>
    %c0_21 = arith.constant 0 : index
    %c0_22 = arith.constant 0 : index
    %46 = vector.load %arg4[%c0_21, %c0_22] : memref<2x256xf32, #tpu.memory_space<vmem>>, vector<1x256xf32>
    %cst_23 = arith.constant 9.99999974E-6 : f32
    %47 = vector.broadcast %cst_23 : f32 to vector<1x256xf32>
    %48 = arith.addf %45, %47 : vector<1x256xf32>
    %49 = math.rsqrt %48 : vector<1x256xf32>
    %50 = arith.mulf %46, %49 : vector<1x256xf32>
    %c1_24 = arith.constant 1 : index
    %c0_25 = arith.constant 0 : index
    %51 = vector.load %arg4[%c1_24, %c0_25] : memref<2x256xf32, #tpu.memory_space<vmem>>, vector<1x256xf32>
    %52 = arith.mulf %36, %50 : vector<1x256xf32>
    %53 = arith.subf %51, %52 : vector<1x256xf32>
    %54 = vector.broadcast %50 : vector<1x256xf32> to vector<8x256xf32>
    %55 = arith.mulf %32, %54 : vector<8x256xf32>
    %56 = vector.broadcast %53 : vector<1x256xf32> to vector<8x256xf32>
    %57 = arith.addf %55, %56 : vector<8x256xf32>
    %cst_26 = arith.constant 0.000000e+00 : f32
    %58 = vector.broadcast %cst_26 : f32 to vector<8x256xf32>
    %59 = arith.maximumf %57, %58 : vector<8x256xf32>
    %60 = arith.truncf %59 : vector<8x256xf32> to vector<8x256xbf16>
    %c0_27 = arith.constant 0 : index
    %c0_28 = arith.constant 0 : index
    %61 = vector.load %arg5[%c0_27, %c0_28] : memref<256x128xbf16, #tpu.memory_space<vmem>>, vector<256x128xbf16>
    %cst_29 = arith.constant dense<0.000000e+00> : vector<8x128xf32>
    %62 = tpu.matmul %60, %61, %cst_29 {dimension_numbers = #tpu.dot_dimension_numbers<[1], [0], [0], [1], [0, 0, 1, 1], [], []>} : vector<8x256xbf16>, vector<256x128xbf16>, vector<8x128xf32> -> vector<8x128xf32>
    %c0_30 = arith.constant 0 : index
    %c0_31 = arith.constant 0 : index
    %63 = vector.load %arg6[%c0_30, %c0_31] : memref<1x128xf32, #tpu.memory_space<vmem>>, vector<1x128xf32>
    %64 = vector.broadcast %63 : vector<1x128xf32> to vector<8x128xf32>
    %65 = arith.addf %62, %64 : vector<8x128xf32>
    %cst_32 = arith.constant dense<0xFF800000> : vector<8xf32>
    %66 = vector.multi_reduction <maximumf>, %65, %cst_32 [1] : vector<8x128xf32> to vector<8xf32>
    %67 = vector.shape_cast %66 : vector<8xf32> to vector<8x1xf32>
    %68 = vector.broadcast %67 : vector<8x1xf32> to vector<8x128xf32>
    %69 = arith.subf %65, %68 : vector<8x128xf32>
    %70 = math.exp %69 : vector<8x128xf32>
    %cst_33 = arith.constant dense<0.000000e+00> : vector<8xf32>
    %71 = vector.multi_reduction <add>, %70, %cst_33 [1] : vector<8x128xf32> to vector<8xf32>
    %72 = vector.shape_cast %71 : vector<8xf32> to vector<8x1xf32>
    %73 = tpu.reciprocal %72 {approx = true} : vector<8x1xf32> -> vector<8x1xf32>
    %74 = arith.mulf %72, %73 : vector<8x1xf32>
    %cst_34 = arith.constant 2.000000e+00 : f32
    %75 = vector.broadcast %cst_34 : f32 to vector<8x1xf32>
    %76 = arith.subf %75, %74 : vector<8x1xf32>
    %77 = arith.mulf %73, %76 : vector<8x1xf32>
    %78 = vector.broadcast %77 : vector<8x1xf32> to vector<8x128xf32>
    %79 = arith.mulf %70, %78 : vector<8x128xf32>
    %c0_35 = arith.constant 0 : index
    %c0_36 = arith.constant 0 : index
    %80 = vector.load %arg7[%c0_35, %c0_36] : memref<8x128xf32, #tpu.memory_space<vmem>>, vector<8x128xf32>
    tpu.vector_store %arg7[%c0_35, %c0_36], %79 {strides = array<i32>} : memref<8x128xf32, #tpu.memory_space<vmem>>, vector<8x128xf32>,
    return
  }
}

</mosaic_0001>

<bundles_post_ra>
// kernel: tpu_custom_call.1
= control target key start
LH: loop header
LB: loop body
LE: loop exit
PB: predicated region body
PF: predicated region fallthrough
CT: control target
= control target key end

     0   :  { %12 = vsyncpa [#allocation3], 0  ;;  %s1266_s0 = inlined_call_operand.hbm [shape: bf16[8,32], index: 0, kind: input, shape index: {}]   ;;  %s1267_s1 = inlined_call_operand.hbm [shape: bf16[32,256], index: 1, kind: input, shape index: {}]   ;;  %s1268_s2 = inlined_call_operand.vmem [shape: f32[2,256], index: 2, kind: input, shape index: {}]   ;;  %s1269_s3 = inlined_call_operand.hbm [shape: bf16[256,256], index: 3, kind: input, shape index: {}]   ;;  %s1270_s4 = inlined_call_operand.vmem [shape: f32[2,256], index: 4, kind: input, shape index: {}]   ;;  %s1271_s5 = inlined_call_operand.hbm [shape: bf16[256,128], index: 5, kind: input, shape index: {}]   ;;  %s1272_s6 = inlined_call_operand.vmem [shape: f32[1,128], index: 6, kind: input, shape index: {}]   ;;  %s1273_s7 = inlined_call_operand.hbm [shape: f32[8,128], index: 7, kind: output, shape index: {}]  }
   0x1   :  { %13 = vsyncpa [#allocation6], 0 }
   0x2   :  { %14 = vsyncpa [#allocation9], 0 }
   0x3   :  { %15 = vsyncpa [#allocation4], 0  ;;  %s1105_s24 = smov [#allocation5]   ;;  %s987_s28 = scalar_lea.hbm %s1267_s1, 512 }
   0x4   :  { %s31_s25 = sshll.u32 %s1105_s24, 4  ;;  %p988_p0 = scmp.ne.s32.totalorder %s1267_s1, %s987_s28  ;;  %s32_s25 = int_to_ptr.vmem [resolvable:$true] %s31_s25 }
   0x5   :  { %p991_p1 = scmp.lt.u32.totalorder %s987_s28, %s1267_s1 }
   0x7   :  { %p993_p2 = pnand %p991_p1, %p988_p0 }
   0x9   :  { %996 = shalt.err (!%p993_p2)
}
   0xa   :  { %s997_s10 = scalar_lea.vmem %s32_s25, 512  ;;  %p1002_p4 = scmp.lt.s32.totalorder %s32_s25, %s32_s25 }
   0xb   :  { %p998_p3 = scmp.ne.s32.totalorder %s32_s25, %s997_s10  ;;  %p1003_p5 = scmp.lt.s32.totalorder %s997_s10, %s997_s10 }
   0xd   :  { %p1004_p6 = por %p1003_p5, %p1002_p4 }
   0xf   :  { %p1005_p7 = pnand %p1004_p6, %p998_p3 }
  0x11   :  { %1008 = shalt.err (!%p1005_p7)
}
  0x12   :  { %s1106_s11 = smov 128   ;;  %s1107_s12 = smov 8  }
  0x13   :  { %37 = dma.hbm_to_vmem [thread:$0]  %s1267_s1, 512, %s32_s25, [#allocation6], %s1106_s11, %s1106_s11, %s1107_s12  }
  0x14   :  { %s1108_s15 = smov [#allocation2]   ;;  %s1109_s17 = smov [#allocation7]  }
  0x15   :  { %s22_s16 = sshll.u32 %s1108_s15, 4  ;;  %s45_s18 = sshll.u32 %s1109_s17, 4  ;;  %s23_s16 = int_to_ptr.vmem [resolvable:$true] %s22_s16  ;;  %s46_s18 = int_to_ptr.vmem [resolvable:$true] %s45_s18 }
  0x16   :  { %s1009_s21 = scalar_lea.hbm %s1266_s0, 64 }
  0x17   :  { %p1010_p8 = scmp.ne.s32.totalorder %s1266_s0, %s1009_s21  ;;  %p1013_p9 = scmp.lt.u32.totalorder %s1009_s21, %s1266_s0 }
  0x19   :  { %p1015_p10 = pnand %p1013_p9, %p1010_p8 }
  0x1b   :  { %1018 = shalt.err (!%p1015_p10)
}
  0x1c   :  { %s1019_s1 = scalar_lea.vmem %s23_s16, 64  ;;  %p1024_p12 = scmp.lt.s32.totalorder %s23_s16, %s23_s16 }
  0x1d   :  { %p1020_p11 = scmp.ne.s32.totalorder %s23_s16, %s1019_s1  ;;  %p1025_p13 = scmp.lt.s32.totalorder %s1019_s1, %s1019_s1 }
  0x1f   :  { %p1026_p0 = por %p1025_p13, %p1024_p12 }
  0x21   :  { %p1027_p1 = pnand %p1026_p0, %p1020_p11 }
  0x23   :  { %1030 = shalt.err (!%p1027_p1)
}
  0x24   :  { %25 = dma.hbm_to_vmem [thread:$0]  %s1266_s0, 64, %s23_s16, [#allocation3]  }
  0x25   :  { %s1031_s30 = scalar_lea.hbm %s1269_s3, 4096 }
  0x26   :  { %p1032_p2 = scmp.ne.s32.totalorder %s1269_s3, %s1031_s30  ;;  %p1035_p3 = scmp.lt.u32.totalorder %s1031_s30, %s1269_s3 }
  0x28   :  { %p1037_p4 = pnand %p1035_p3, %p1032_p2 }
  0x2a   :  { %1040 = shalt.err (!%p1037_p4)
}
  0x2b   :  { %s1041_s14 = scalar_lea.vmem %s46_s18, 4096  ;;  %p1046_p6 = scmp.lt.s32.totalorder %s46_s18, %s46_s18 }
  0x2c   :  { %p1042_p5 = scmp.ne.s32.totalorder %s46_s18, %s1041_s14  ;;  %p1047_p7 = scmp.lt.s32.totalorder %s1041_s14, %s1041_s14 }
  0x2e   :  { %p1048_p8 = por %p1047_p7, %p1046_p6 }
  0x30   :  { %p1049_p9 = pnand %p1048_p8, %p1042_p5 }
  0x32   :  { %1052 = shalt.err (!%p1049_p9)
}
  0x33   :  { %51 = dma.hbm_to_vmem [thread:$0]  %s1269_s3, 4096, %s46_s18, [#allocation6], %s1106_s11, %s1106_s11, %s1107_s12  }
  0x34   :  { %s1110_s16 = smov [#allocation8]   ;;  %s1053_s21 = scalar_lea.hbm %s1271_s5, 2048 }
  0x35   :  { %s59_s17 = sshll.u32 %s1110_s16, 4  ;;  %p1054_p10 = scmp.ne.s32.totalorder %s1271_s5, %s1053_s21  ;;  %s60_s17 = int_to_ptr.vmem [resolvable:$true] %s59_s17 }
  0x36   :  { %p1057_p11 = scmp.lt.u32.totalorder %s1053_s21, %s1271_s5 }
  0x38   :  { %p1059_p12 = pnand %p1057_p11, %p1054_p10 }
  0x3a   :  { %1062 = shalt.err (!%p1059_p12)
}
  0x3b   :  { %s1063_s1 = scalar_lea.vmem %s60_s17, 2048  ;;  %p1068_p0 = scmp.lt.s32.totalorder %s60_s17, %s60_s17 }
  0x3c   :  { %p1064_p13 = scmp.ne.s32.totalorder %s60_s17, %s1063_s1  ;;  %p1069_p1 = scmp.lt.s32.totalorder %s1063_s1, %s1063_s1 }
  0x3e   :  { %p1070_p2 = por %p1069_p1, %p1068_p0 }
  0x40   :  { %p1071_p3 = pnand %p1070_p2, %p1064_p13 }
  0x42   :  { %1074 = shalt.err (!%p1071_p3)
}
  0x43   :  { %s1111_s3 = smov 64   ;;  %s1112_s11 = smov 4  }
  0x44   :  { %65 = dma.hbm_to_vmem [thread:$0]  %s1271_s5, 2048, %s60_s17, [#allocation9], %s1111_s3, %s1111_s3, %s1112_s11  }
  0x45   :  { %1097 = dma.done.wait [#allocation3], 64  }
  0x46   :  { %1098 = vsyncadd [#allocation3], 4294967232 }
  0x47   :  { %1099 = dma.done.wait [#allocation6], 4608  }
  0x48   :  { %1100 = vsyncadd [#allocation6], 4294962688 }
  0x49   :  { %1101 = dma.done.wait [#allocation9], 2048  }
  0x4a   :  { %1102 = vsyncadd [#allocation9], 4294965248  ;;  %v1113_v0 = vmov 0   ;;  %v905_v1 = vld [vmem:[#allocation5 + $0x4] ss:$8 sps:$4 sm:$0xff]   ;;  %vm106_vm0 = vcmask 261120  }
  0x4b   :  { %142 = vmatprep.mubr.bf16.mxu0 %v1113_v0  ;;  %v907_v2 = vld [vmem:[#allocation5] ss:$8 sps:$4 sm:$0xff]   ;;  %110 = vmatprep.subr.bf16.mxu0 %v905_v1  ;;  %v908_v3 = vld [vmem:[#allocation5 + $0x14] ss:$8 sps:$4 sm:$0xff]   ;;  %v910_v4 = vld [vmem:[#allocation5 + $0x10] ss:$8 sps:$4 sm:$0xff]  }
  0x4c   :  { %111 = vmatpush1.bf16.msra.mxu0 %v907_v2  ;;  %v81_v5 = vld [vmem:[#allocation2] sm:$0xf]  ;;  %v911_v6 = vld [vmem:[#allocation7 + $0x4] ss:$8 sps:$4 sm:$0xff]   ;;  %v913_v7 = vld [vmem:[#allocation7] ss:$8 sps:$4 sm:$0xff]  }
  0x4d   :  { %112 = vmatprep.subr.bf16.mxu0 %v908_v3  ;;  %457 = vmatprep.subr.bf16.mxu1 %v911_v6  ;;  %v914_v8 = vld [vmem:[#allocation7 + $0x14] ss:$8 sps:$4 sm:$0xff]   ;;  %v916_v9 = vld [vmem:[#allocation7 + $0x10] ss:$8 sps:$4 sm:$0xff]   ;;  %v917_v10 = vld [vmem:[#allocation7 + $0x24] ss:$8 sps:$4 sm:$0xff]  }
  0x4e   :  { %458 = vmatpush1.bf16.msra.mxu1 %v913_v7  ;;  %v919_v11 = vld [vmem:[#allocation7 + $0x20] ss:$8 sps:$4 sm:$0xff]   ;;  %v920_v12 = vld [vmem:[#allocation7 + $0x34] ss:$8 sps:$4 sm:$0xff]   ;;  %v922_v13 = vld [vmem:[#allocation7 + $0x30] ss:$8 sps:$4 sm:$0xff]  }
  0x4f   :  { %459 = vmatprep.subr.bf16.mxu1 %v914_v8  ;;  %v923_v14 = vld [vmem:[#allocation7 + $0x44] ss:$8 sps:$4 sm:$0xff]   ;;  %v925_v15 = vld [vmem:[#allocation7 + $0x40] ss:$8 sps:$4 sm:$0xff]   ;;  %v926_v16 = vld [vmem:[#allocation7 + $0x54] ss:$8 sps:$4 sm:$0xff]  }
  0x50   :  { %113 = vmatpush1.bf16.msra.mxu0 %v910_v4  ;;  %v928_v17 = vld [vmem:[#allocation7 + $0x50] ss:$8 sps:$4 sm:$0xff]   ;;  %v929_v18 = vld [vmem:[#allocation7 + $0x64] ss:$8 sps:$4 sm:$0xff]   ;;  %v931_v19 = vld [vmem:[#allocation7 + $0x60] ss:$8 sps:$4 sm:$0xff]  }
  0x51   :  { %v932_v20 = vld [vmem:[#allocation7 + $0x74] ss:$8 sps:$4 sm:$0xff]   ;;  %v934_v21 = vld [vmem:[#allocation7 + $0x70] ss:$8 sps:$4 sm:$0xff]   ;;  %v935_v22 = vld [vmem:[#allocation7 + $0x84] ss:$8 sps:$4 sm:$0xff]  }
  0x52   :  { %460 = vmatpush1.bf16.msra.mxu1 %v916_v9  ;;  %v937_v23 = vld [vmem:[#allocation7 + $0x80] ss:$8 sps:$4 sm:$0xff]   ;;  %v938_v24 = vld [vmem:[#allocation7 + $0x94] ss:$8 sps:$4 sm:$0xff]   ;;  %v940_v25 = vld [vmem:[#allocation7 + $0x90] ss:$8 sps:$4 sm:$0xff]  }
  0x53   :  { %820 = vmatmul.mubr.msk.bf16.vlgmr.msra.gmra.mrb[0].mxu0 %vm106_vm0, %v81_v5  ;;  %461 = vmatprep.subr.bf16.mxu1 %v917_v10  ;;  %v941_v26 = vld [vmem:[#allocation7 + $0xa4] ss:$8 sps:$4 sm:$0xff]   ;;  %v943_v27 = vld [vmem:[#allocation7 + $0xa0] ss:$8 sps:$4 sm:$0xff]   ;;  %v944_v28 = vld [vmem:[#allocation7 + $0xb4] ss:$8 sps:$4 sm:$0xff]  }
  0x54   :  { %v946_v29 = vld [vmem:[#allocation7 + $0xb0] ss:$8 sps:$4 sm:$0xff]   ;;  %v947_v30 = vld [vmem:[#allocation7 + $0xc4] ss:$8 sps:$4 sm:$0xff]   ;;  %v949_v31 = vld [vmem:[#allocation7 + $0xc0] ss:$8 sps:$4 sm:$0xff]  }
  0x55   :  { %v950_v32 = vld [vmem:[#allocation7 + $0xd4] ss:$8 sps:$4 sm:$0xff]   ;;  %v952_v33 = vld [vmem:[#allocation7 + $0xd0] ss:$8 sps:$4 sm:$0xff]   ;;  %v953_v34 = vld [vmem:[#allocation7 + $0xe4] ss:$8 sps:$4 sm:$0xff]  }
  0x56   :  { %462 = vmatpush1.bf16.msra.mxu1 %v919_v11  ;;  %v955_v35 = vld [vmem:[#allocation7 + $0xe0] ss:$8 sps:$4 sm:$0xff]   ;;  %v956_v36 = vld [vmem:[#allocation7 + $0xf4] ss:$8 sps:$4 sm:$0xff]   ;;  %v958_v37 = vld [vmem:[#allocation7 + $0xf0] ss:$8 sps:$4 sm:$0xff]  }
  0x57   :  { %463 = vmatprep.subr.bf16.mxu1 %v920_v12 }
  0x5a   :  { %464 = vmatpush1.bf16.msra.mxu1 %v922_v13 }
  0x5b   :  { %465 = vmatprep.subr.bf16.mxu1 %v923_v14 }
  0x5e   :  { %466 = vmatpush1.bf16.msra.mxu1 %v925_v15 }
  0x5f   :  { %467 = vmatprep.subr.bf16.mxu1 %v926_v16  ;;  %v1114_v16 = vmov 1966171168  }
  0x62   :  { %468 = vmatpush1.bf16.msra.mxu1 %v928_v17  ;;  %v197_v17 = vunpack.c.l.s4 %v1114_v16 }
  0x63   :  { %469 = vmatprep.subr.bf16.mxu1 %v929_v18  ;;  %v199_v18 = vlaneseq }
  0x66   :  { %470 = vmatpush1.bf16.msra.mxu1 %v931_v19  ;;  %v198_v19 = vunpack.c.0.s8 %v197_v17 }
  0x67   :  { %471 = vmatprep.subr.bf16.mxu1 %v932_v20  ;;  %v200_v20 = vshrl.u32 %v199_v18, 7 }
  0x6a   :  { %472 = vmatpush1.bf16.msra.mxu1 %v934_v21 }
  0x6b   :  { %473 = vmatprep.subr.bf16.mxu1 %v935_v22  ;;  %v1216_v22 = vsub.s32 %v198_v19, %v200_v20 }
  0x6e   :  { %474 = vmatpush1.bf16.msra.mxu1 %v937_v23 }
  0x6f   :  { %475 = vmatprep.subr.bf16.mxu1 %v938_v24 }
  0x72   :  { %476 = vmatpush1.bf16.msra.mxu1 %v940_v25 }
  0x73   :  { %477 = vmatprep.subr.bf16.mxu1 %v941_v26  ;;  %v188_v26 = vld [vmem:[%s1268_s2] ss:$2 sm:$0x3] }
  0x76   :  { %478 = vmatpush1.bf16.msra.mxu1 %v943_v27 }
  0x77   :  { %479 = vmatprep.subr.bf16.mxu1 %v944_v28  ;;  %v1223_v28 = vsub.s32 0, %v200_v20 }
  0x7a   :  { %480 = vmatpush1.bf16.msra.mxu1 %v946_v29  ;;  %v1225_v29 = vsub.s32 1, %v200_v20 }
  0x7b   :  { %481 = vmatprep.subr.bf16.mxu1 %v947_v30 }
  0x7e   :  { %482 = vmatpush1.bf16.msra.mxu1 %v949_v31 }
  0x7f   :  { %483 = vmatprep.subr.bf16.mxu1 %v950_v32 }
  0x82   :  { %484 = vmatpush1.bf16.msra.mxu1 %v952_v33 }
  0x83   :  { %485 = vmatprep.subr.bf16.mxu1 %v953_v34 }
  0x86   :  { %486 = vmatpush1.bf16.msra.mxu1 %v955_v35 }
  0x87   :  { %487 = vmatprep.subr.bf16.mxu1 %v956_v36 }
  0x8a   :  { %488 = vmatpush1.bf16.msra.mxu1 %v958_v37 }
 0x126   :  { %v1210_v38 = vpop.f32.mrb[0].mxu0 }
 0x127   :  { %v151_v39 = vrot.slane %v1210_v38, 4  ;;  %v166_v40 = vmul.f32 %v1210_v38, %v1210_v38  ;;  %v146_v41 = vpop.f32.mrb[1].mxu0 }
 0x128   :  { %v157_v42 = vrot.slane %v146_v41, 4  ;;  %v167_v43 = vmul.f32 %v146_v41, %v146_v41  ;;  %v148_v44 = vpop.f32.mrb[2].mxu0 }
 0x129   :  { %v152_v45 = vadd.f32 %v151_v39, %v1210_v38  ;;  %v168_v46 = vrot.slane %v166_v40, 4  ;;  %v149_v47 = vpop.f32.mrb[3].mxu0 }
 0x12a   :  { %v158_v48 = vadd.f32 %v157_v42, %v146_v41  ;;  %v174_v49 = vrot.slane %v167_v43, 4 }
 0x12b   :  { %v153_v50 = vrot.slane %v152_v45, 2  ;;  %v169_v51 = vadd.f32 %v168_v46, %v166_v40  ;;  %v821_v40 = vld [vmem:[%s1268_s2 + $0x1] ss:$2 sm:$0x3] }
 0x12c   :  { %v159_v52 = vrot.slane %v158_v48, 2  ;;  %v175_v53 = vadd.f32 %v174_v49, %v167_v43 }
 0x12d   :  { %v154_v54 = vadd.f32 %v153_v50, %v152_v45  ;;  %v170_v55 = vrot.slane %v169_v51, 2  ;;  %v959_v50 = vld [vmem:[#allocation8 + $0x40] sm:$0xff]  }
 0x12e   :  { %v160_v56 = vadd.f32 %v159_v52, %v158_v48  ;;  %v176_v57 = vrot.slane %v175_v53, 2  ;;  %872 = vmatprep.subr.bf16.mxu0 %v959_v50  ;;  %v961_v52 = vld [vmem:[#allocation8 + $0x48] sm:$0xff]  }
 0x12f   :  { %v155_v58 = vrot.slane %v154_v54, 1  ;;  %v171_v59 = vadd.f32 %v170_v55, %v169_v51  ;;  %v960_v51 = vld [vmem:[#allocation8] sm:$0xff]   ;;  %v964_v55 = vld [vmem:[#allocation8 + $0x10] sm:$0xff]  }
 0x130   :  { %v161_v60 = vrot.slane %v160_v56, 1  ;;  %v177_v61 = vadd.f32 %v176_v57, %v175_v53  ;;  %873 = vmatpush3.bf16.msra.mxu0 %v960_v51  ;;  %v962_v53 = vld [vmem:[#allocation8 + $0x8] sm:$0xff]   ;;  %v966_v57 = vld [vmem:[#allocation8 + $0x18] sm:$0xff]  }
 0x131   :  { %v156_v62 = vadd.f32 %v155_v58, %v154_v54  ;;  %v172_v63 = vrot.slane %v171_v59, 1  ;;  %874 = vmatprep.subr.bf16.mxu0 %v961_v52  ;;  %v963_v54 = vld [vmem:[#allocation8 + $0x50] sm:$0xff]   ;;  %v967_v58 = vld [vmem:[#allocation8 + $0x60] sm:$0xff]   ;;  %v534_v51 = vld [vmem:[%s1270_s4] ss:$2 sm:$0x3] }
 0x132   :  { %v178_v0 = vrot.slane %v177_v61, 1  ;;  %v162_v1 = vadd.f32 %v161_v60, %v160_v56  ;;  %v965_v56 = vld [vmem:[#allocation8 + $0x58] sm:$0xff]   ;;  %v969_v60 = vld [vmem:[#allocation8 + $0x68] sm:$0xff]  }
 0x133   :  { %v164_v2 = vmul.f32 0.125, %v156_v62  ;;  %v173_v3 = vadd.f32 %v172_v63, %v171_v59  ;;  %v968_v59 = vld [vmem:[#allocation8 + $0x20] sm:$0xff]   ;;  %v971_v62 = vld [vmem:[#allocation8 + $0x70] sm:$0xff]  }
 0x134   :  { %v179_v4 = vadd.f32 %v178_v0, %v177_v61  ;;  %v165_v5 = vmul.f32 0.125, %v162_v1  ;;  %875 = vmatpush3.bf16.msra.mxu0 %v962_v53  ;;  %v970_v61 = vld [vmem:[#allocation8 + $0x28] sm:$0xff]   ;;  %v972_v63 = vld [vmem:[#allocation8 + $0x30] sm:$0xff]   ;;  %v973_v0 = vld [vmem:[#allocation8 + $0x78] sm:$0xff]  }
 0x135   :  { %v180_v6 = vmul.f32 0.125, %v173_v3  ;;  %v182_v7 = vmul.f32 %v164_v2, %v164_v2  ;;  %876 = vmatprep.subr.bf16.mxu0 %v963_v54  ;;  %v974_v1 = vld [vmem:[#allocation8 + $0x38] sm:$0xff]  }
 0x136   :  { %v181_v8 = vmul.f32 0.125, %v179_v4  ;;  %v183_v9 = vmul.f32 %v165_v5, %v165_v5 }
 0x137   :  { %v184_v10 = vsub.f32 %v180_v6, %v182_v7 }
 0x138   :  { %v185_v11 = vsub.f32 %v181_v8, %v183_v9  ;;  %877 = vmatpush3.bf16.msra.mxu0 %v964_v55 }
 0x139   :  { %v186_v12 = vmax.f32 %v184_v10, 0.0  ;;  %878 = vmatprep.subr.bf16.mxu0 %v965_v56 }
 0x13a   :  { %v187_v13 = vmax.f32 %v185_v11, 0.0 }
 0x13b   :  { %v189_v14 = vadd.f32 1e-05, %v186_v12 }
 0x13c   :  { %v190_v15 = vadd.f32 1e-05, %v187_v13  ;;  %879 = vmatpush3.bf16.msra.mxu0 %v966_v57 }
 0x13d   :  { %975 = vrsqrt.f32 %v189_v14  ;;  %880 = vmatprep.subr.bf16.mxu0 %v967_v58 }
 0x13e   :  { %977 = vrsqrt.f32 %v190_v15 }
 0x140   :  { %881 = vmatpush3.bf16.msra.mxu0 %v968_v59 }
 0x141   :  { %882 = vmatprep.subr.bf16.mxu0 %v969_v60 }
 0x144   :  { %883 = vmatpush3.bf16.msra.mxu0 %v970_v61 }
 0x145   :  { %884 = vmatprep.subr.bf16.mxu0 %v971_v62  ;;  %v854_v62 = vld [vmem:[%s1270_s4 + $0x1] ss:$2 sm:$0x3]  ;;  %s1115_s4 = smov [#allocation10]  }
 0x146   :  { %s805_s13 = sshll.u32 %s1115_s4, 4  ;;  %s806_s13 = int_to_ptr.vmem [resolvable:$true] %s805_s13 }
 0x147   :  { %v976_v21 = vpop.eup %975  ;;  %p1080_p5 = scmp.lt.s32.totalorder %s806_s13, %s806_s13 }
 0x148   :  { %v978_v23 = vpop.eup %977  ;;  %885 = vmatpush3.bf16.msra.mxu0 %v972_v63 }
 0x149   :  { %v195_v24 = vcombine.low %v976_v21, %v978_v23  ;;  %886 = vmatprep.subr.bf16.mxu0 %v973_v0 }
 0x14b   :  { %v202_v25 = vrot.slane %v195_v24, %v1216_v22 }
 0x14c   :  { %887 = vmatpush3.bf16.msra.mxu0 %v974_v1 }
 0x14d   :  { %v209_v27 = vrot.slane %v202_v25, %v1216_v22 }
 0x14f   :  { %v211_v30 = vmul.f32 %v209_v27, %v188_v26 }
 0x151   :  { %v218_v31 = vrot.slane %v211_v30, %v1223_v28  ;;  %v222_v32 = vrot.slane %v211_v30, %v1225_v29 }
 0x153   :  { %v225_v33 = vmul.f32 %v218_v31, %v164_v2  ;;  %v226_v34 = vmul.f32 %v222_v32, %v165_v5  ;;  %v247_v35 = vmul.f32 %v222_v32, %v146_v41  ;;  %v246_v36 = vmul.f32 %v218_v31, %v1210_v38 }
 0x155   :  { %v229_v37 = vcombine.low %v225_v33, %v226_v34 }
 0x157   :  { %v236_v39 = vrot.slane %v229_v37, %v1216_v22 }
 0x159   :  { %v243_v42 = vrot.slane %v236_v39, %v1216_v22 }
 0x15b   :  { %v245_v43 = vsub.f32 %v821_v40, %v243_v42 }
 0x15d   :  { %v256_v44 = vrot.slane %v245_v43, %v1225_v29  ;;  %v252_v45 = vrot.slane %v245_v43, %v1223_v28 }
 0x15f   :  { %v260_v46 = vadd.f32 %v256_v44, %v247_v35  ;;  %v259_v47 = vadd.f32 %v252_v45, %v246_v36 }
 0x161   :  { %v262_v48 = vmax.f32 %v260_v46, 0.0  ;;  %v261_v41 = vmax.f32 %v259_v47, 0.0 }
 0x163   :  { %v264_v49 = vpack.c.bf16 %v262_v48, %v262_v48  ;;  %v263_v38 = vpack.c.bf16 %v261_v41, %v261_v41 }
 0x165   :  { %489 = vmatprep.mubr.bf16.mxu1 %v264_v49 }
 0x166   :  { %490 = vmatmul.mubr.bf16.vlgmr.msra.gmra.mrb[0].mxu1 %v263_v38 }
 0x239   :  { %v491_v2 = vpop.f32.mrb[0].mxu1 }
 0x23a   :  { %v498_v3 = vrot.slane %v491_v2, 4  ;;  %v512_v4 = vmul.f32 %v491_v2, %v491_v2  ;;  %v493_v5 = vpop.f32.mrb[1].mxu1 }
 0x23b   :  { %v504_v6 = vrot.slane %v493_v5, 4  ;;  %v513_v7 = vmul.f32 %v493_v5, %v493_v5  ;;  %v495_v8 = vpop.f32.mrb[2].mxu1 }
 0x23c   :  { %v499_v9 = vadd.f32 %v498_v3, %v491_v2  ;;  %v514_v10 = vrot.slane %v512_v4, 4  ;;  %v496_v11 = vpop.f32.mrb[3].mxu1 }
 0x23d   :  { %v505_v12 = vadd.f32 %v504_v6, %v493_v5  ;;  %v520_v13 = vrot.slane %v513_v7, 4  ;;  %v855_v11 = vld [vmem:[%s1272_s6] ss:$0 sm:$0xff]  ;;  %s1075_s6 = scalar_lea.vmem %s806_s13, 128 }
 0x23e   :  { %v500_v14 = vrot.slane %v499_v9, 2  ;;  %v515_v15 = vadd.f32 %v514_v10, %v512_v4  ;;  %p1076_p4 = scmp.ne.s32.totalorder %s806_s13, %s1075_s6  ;;  %p1081_p6 = scmp.lt.s32.totalorder %s1075_s6, %s1075_s6 }
 0x23f   :  { %v506_v16 = vrot.slane %v505_v12, 2  ;;  %v521_v17 = vadd.f32 %v520_v13, %v513_v7 }
 0x240   :  { %v501_v18 = vadd.f32 %v500_v14, %v499_v9  ;;  %v516_v19 = vrot.slane %v515_v15, 2  ;;  %p1082_p7 = por %p1081_p6, %p1080_p5 }
 0x241   :  { %v507_v20 = vadd.f32 %v506_v16, %v505_v12  ;;  %v522_v21 = vrot.slane %v521_v17, 2 }
 0x242   :  { %v502_v23 = vrot.slane %v501_v18, 1  ;;  %v517_v24 = vadd.f32 %v516_v19, %v515_v15  ;;  %p1083_p8 = pnand %p1082_p7, %p1076_p4 }
 0x243   :  { %v508_v25 = vrot.slane %v507_v20, 1  ;;  %v523_v26 = vadd.f32 %v522_v21, %v521_v17 }
 0x244   :  { %v503_v27 = vadd.f32 %v502_v23, %v501_v18  ;;  %v518_v30 = vrot.slane %v517_v24, 1 }
 0x245   :  { %v509_v31 = vadd.f32 %v508_v25, %v507_v20  ;;  %v524_v32 = vrot.slane %v523_v26, 1 }
 0x246   :  { %v510_v33 = vmul.f32 0.125, %v503_v27  ;;  %v519_v34 = vadd.f32 %v518_v30, %v517_v24 }
 0x247   :  { %v511_v35 = vmul.f32 0.125, %v509_v31  ;;  %v525_v36 = vadd.f32 %v524_v32, %v523_v26 }
 0x248   :  { %v526_v37 = vmul.f32 0.125, %v519_v34  ;;  %v528_v39 = vmul.f32 %v510_v33, %v510_v33 }
 0x249   :  { %v527_v40 = vmul.f32 0.125, %v525_v36  ;;  %v529_v42 = vmul.f32 %v511_v35, %v511_v35 }
 0x24a   :  { %v530_v43 = vsub.f32 %v526_v37, %v528_v39 }
 0x24b   :  { %v531_v44 = vsub.f32 %v527_v40, %v529_v42 }
 0x24c   :  { %v532_v45 = vmax.f32 %v530_v43, 0.0 }
 0x24d   :  { %v533_v46 = vmax.f32 %v531_v44, 0.0 }
 0x24e   :  { %v535_v47 = vadd.f32 1e-05, %v532_v45 }
 0x24f   :  { %v536_v48 = vadd.f32 1e-05, %v533_v46 }
 0x250   :  { %979 = vrsqrt.f32 %v535_v47 }
 0x251   :  { %981 = vrsqrt.f32 %v536_v48 }
 0x25a   :  { %v980_v41 = vpop.eup %979 }
 0x25b   :  { %v982_v49 = vpop.eup %981 }
 0x25c   :  { %v541_v38 = vcombine.low %v980_v41, %v982_v49 }
 0x25e   :  { %v548_v50 = vrot.slane %v541_v38, %v1216_v22 }
 0x260   :  { %v555_v52 = vrot.slane %v548_v50, %v1216_v22 }
 0x262   :  { %v557_v53 = vmul.f32 %v555_v52, %v534_v51 }
 0x264   :  { %v564_v54 = vrot.slane %v557_v53, %v1223_v28  ;;  %v568_v55 = vrot.slane %v557_v53, %v1225_v29 }
 0x266   :  { %v571_v56 = vmul.f32 %v564_v54, %v510_v33  ;;  %v572_v57 = vmul.f32 %v568_v55, %v511_v35  ;;  %v593_v58 = vmul.f32 %v568_v55, %v493_v5  ;;  %v592_v59 = vmul.f32 %v564_v54, %v491_v2 }
 0x268   :  { %v575_v60 = vcombine.low %v571_v56, %v572_v57 }
 0x26a   :  { %v582_v61 = vrot.slane %v575_v60, %v1216_v22 }
 0x26c   :  { %v589_v63 = vrot.slane %v582_v61, %v1216_v22 }
 0x26e   :  { %v591_v0 = vsub.f32 %v854_v62, %v589_v63 }
 0x270   :  { %v602_v1 = vrot.slane %v591_v0, %v1225_v29  ;;  %v598_v3 = vrot.slane %v591_v0, %v1223_v28 }
 0x272   :  { %v606_v4 = vadd.f32 %v602_v1, %v593_v58  ;;  %v605_v6 = vadd.f32 %v598_v3, %v592_v59 }
 0x274   :  { %v608_v7 = vmax.f32 %v606_v4, 0.0  ;;  %v607_v8 = vmax.f32 %v605_v6, 0.0 }
 0x276   :  { %v610_v5 = vpack.c.bf16 %v608_v7, %v608_v7  ;;  %v609_v2 = vpack.c.bf16 %v607_v8, %v607_v8 }
 0x278   :  { %778 = vmatprep.mubr.bf16.mxu0 %v610_v5 }
 0x279   :  { %779 = vmatmul.mubr.bf16.vlgmr.msra.gmra.mrb[4].mxu0 %v609_v2 }
 0x34c   :  { %v888_v9 = vpop.f32.mrb[4].mxu0 }
 0x34d   :  { %v889_v10 = vpop.f32.mrb[5].mxu0 }
 0x34e   :  { %v890_v22 = vadd.f32 %v889_v10, %v888_v9  ;;  %v891_v12 = vpop.f32.mrb[6].mxu0 }
 0x34f   :  { %v892_v13 = vpop.f32.mrb[7].mxu0 }
 0x350   :  { %v781_v29 = vadd.f32 %v890_v22, %v855_v11 }
 0x352   :  { %786 = vmax.xlane.f32.xlu0 %v781_v29 }
 0x3df   :  { %v787_v28 = vpop.xlane.xlu0 %786 }
 0x3e0   :  { %v788_v14 = vsub.f32 %v781_v29, %v787_v28 }
 0x3e2   :  { %v789_v15 = vmul.f32 1.442695, %v788_v14 }
 0x3e4   :  { %983 = vpow2.f32 %v789_v15 }
 0x3ee   :  { %v984_v16 = vpop.eup %983 }
 0x3ef   :  { %791 = vadd.xlane.f32.xlu0 %v984_v16 }
 0x47c   :  { %v792_v17 = vpop.xlane.xlu0 %791 }
 0x47d   :  { %985 = vrcp.f32 %v792_v17 }
 0x487   :  { %v986_v18 = vpop.eup %985 }
 0x488   :  { %v794_v19 = vmul.f32 %v986_v18, %v792_v17 }
 0x48a   :  { %v795_v20 = vsub.f32 2.0, %v794_v19 }
 0x48c   :  { %v796_v21 = vmul.f32 %v986_v18, %v795_v20 }
 0x48e   :  { %v797_v23 = vmul.f32 %v984_v16, %v796_v21 }
 0x490   :  { %798 = vst [vmem:[#allocation10] sm:$0xff] %v797_v23 }
 0x491   :  { %1086 = shalt.err (!%p1083_p8)
}
 0x492   :  { %s1087_s15 = scalar_lea.hbm %s1273_s7, 128 }
 0x493   :  { %p1088_p9 = scmp.ne.s32.totalorder %s1273_s7, %s1087_s15  ;;  %p1091_p10 = scmp.lt.u32.totalorder %s1087_s15, %s1273_s7 }
 0x495   :  { %p1093_p11 = pnand %p1091_p10, %p1088_p9 }
 0x497   :  { %1096 = shalt.err (!%p1093_p11)
}
 0x498   :  { %808 = dma.vmem_to_hbm [thread:$0]  %s806_s13, 128, %s1273_s7, [#allocation4]  }
 0x499   :  { %1103 = dma.done.wait [#allocation4], 128  }
 0x49a   :  { %1104 = vsyncadd [#allocation4], 4294967168 }
 0x49b   :  { %812 = vsyncpa [#allocation3], 1 }
 0x49c   :  { %813 = vsyncpa [#allocation6], 1 }
 0x49d   :  { %814 = vsyncpa [#allocation9], 1 }
 0x49e   :  { %815 = vsyncpa [#allocation4], 1 }

</bundles_post_ra>
